<compile_context>
chip_gen: v5e
topology: v5e:2x2
jax: 0.10.0
libtpu: 0.0.40
codegen_flags: <defaults>
</compile_context>

<pallas_src>
import functools

import jax
import jax.numpy as jnp
from jax.experimental import pallas as pl
from jax.experimental.pallas import tpu as pltpu

_TARGET_BLOCK_BYTES = 2 * 1024 * 1024  # ~2 MiB per block


def _round_up(a: int, b: int) -> int:
    return (a + b - 1) // b * b


def _sine_kernel(x_ref, o_ref, *, w0: float):
    # Elementwise y = sin(w0 * x). Compute in f32 (upcast is free for f32
    # inputs; for bf16 it preserves phase accuracy when w0 is large).
    x = x_ref[...].astype(jnp.float32)
    if w0 != 1.0:                      # trace-time constant: no VALU op when w0 == 1
        x = x * jnp.float32(w0)
    o_ref[...] = jnp.sin(x).astype(o_ref.dtype)


def _sine_2d(x2d: jax.Array, w0: float) -> jax.Array:
    rows, lanes = x2d.shape
    itemsize = x2d.dtype.itemsize
    # Sublane packing multiple: 8 rows/vreg @32-bit, 16 @16-bit, 32 @8-bit.
    pack = max(8, 32 // itemsize)

    if rows <= pack:
        block_rows = rows              # single full-array block
    else:
        max_block_rows = max(
            pack, (_TARGET_BLOCK_BYTES // (lanes * itemsize)) // pack * pack
        )
        # Balanced grid: caps row padding at < pack rows, and keeps >= 2 steps
        # so the "parallel" axis can shard across both v7x TensorCores.
        steps = max(2, pl.cdiv(rows, max_block_rows))
        block_rows = min(max_block_rows, _round_up(pl.cdiv(rows, steps), pack))

    grid = (pl.cdiv(rows, block_rows),)
    n = rows * lanes

    return pl.pallas_call(
        functools.partial(_sine_kernel, w0=w0),
        out_shape=jax.ShapeDtypeStruct((rows, lanes), x2d.dtype),
        grid=grid,
        in_specs=[pl.BlockSpec((block_rows, lanes), lambda i: (i, 0))],
        out_specs=pl.BlockSpec((block_rows, lanes), lambda i: (i, 0)),
        compiler_params=pltpu.CompilerParams(
            dimension_semantics=("parallel",),
        ),
        cost_estimate=pl.CostEstimate(
            flops=10 * n,              # sin = range-reduction + polynomial on the VPU
            transcendentals=n,
            bytes_accessed=2 * n * itemsize,
        ),
    )(x2d)


def sine(x: jax.Array, w0: float = 1.0) -> jax.Array:
    """Applies y = sin(w0 * x) elementwise via a tiled Pallas TPU kernel."""
    orig_shape = x.shape
    n = x.size
    if n == 0:
        return x

    # Fast path: pick a lane-dense width (multiple of 128) that divides n
    # exactly -> no pad, no output slice, just reshapes.
    lanes = next((c for c in (1024, 512, 256, 128) if n % c == 0), None)
    if lanes is not None:
        out2d = _sine_2d(x.reshape(n // lanes, lanes), w0)
        return out2d.reshape(orig_shape)

    # Ragged slow path (n not a multiple of 128): pad the flat view to a
    # 128-lane multiple, run the same kernel, slice the valid prefix back.
    # TODO(synk): mask the last tile in-kernel (scalar-prefetched n) to avoid
    # the pad/slice round-trips for large ragged inputs.
    lanes = 128
    n_pad = _round_up(n, lanes)
    x_flat = jnp.pad(x.reshape(-1), (0, n_pad - n))
    out2d = _sine_2d(x_flat.reshape(n_pad // lanes, lanes), w0)
    return out2d.reshape(-1)[:n].reshape(orig_shape)


if __name__ == "__main__":
    key = jax.random.PRNGKey(0)
    x = jax.random.normal(key, (2, 4, 16, 16), dtype=jnp.float32)

    # w0 = 1.0 (module default)
    y = sine(x, w0=1.0)
    jax.block_until_ready(y)
    assert y.shape == x.shape and y.dtype == x.dtype
    assert jnp.allclose(y, jnp.sin(x), atol=1e-5, rtol=1e-5), "mismatch vs sin(x)"

    # w0 = 30.0 (typical SIREN first-layer frequency)
    y30 = sine(x, w0=30.0)
    jax.block_until_ready(y30)
    assert jnp.allclose(y30, jnp.sin(30.0 * x), atol=1e-4, rtol=1e-4), "mismatch vs sin(30x)"

    # Ragged shape exercises the slow-path fallback.
    xr = jax.random.normal(jax.random.PRNGKey(1), (7, 13), dtype=jnp.float32)
    yr = sine(xr, w0=30.0)
    jax.block_until_ready(yr)
    assert yr.shape == xr.shape and yr.dtype == xr.dtype
    assert jnp.allclose(yr, jnp.sin(30.0 * xr), atol=1e-4, rtol=1e-4), "mismatch (ragged)"

    print("KERNEL_OK")
</pallas_src>

<mosaic_0001>
module attributes {stable_mosaic.version = 11 : i64} {
  func.func @_sine_kernel(%arg0: i32, %arg1: memref<2x1024xf32, #tpu.memory_space<vmem>>, %arg2: memref<2x1024xf32, #tpu.memory_space<vmem>>) attributes {dimension_semantics = [#tpu.dimension_semantics<parallel>], iteration_bounds = array<i64: 1>, scalar_prefetch = 0 : i64, scratch_operands = 0 : i64, tpu.core_type = #tpu.core_type<tc>, window_params = [{transform_indices = @transform_0, window_bounds = array<i64: 2, 1024>}, {transform_indices = @transform_1, window_bounds = array<i64: 2, 1024>}]} {
    %c0 = arith.constant 0 : index
    %c0_0 = arith.constant 0 : index
    %0 = vector.load %arg1[%c0, %c0_0] : memref<2x1024xf32, #tpu.memory_space<vmem>>, vector<2x1024xf32>
    %1 = math.sin %0 : vector<2x1024xf32>
    %c0_1 = arith.constant 0 : index
    %c0_2 = arith.constant 0 : index
    %2 = vector.load %arg2[%c0_1, %c0_2] : memref<2x1024xf32, #tpu.memory_space<vmem>>, vector<2x1024xf32>
    tpu.vector_store %arg2[%c0_1, %c0_2], %1 {strides = array<i32>} : memref<2x1024xf32, #tpu.memory_space<vmem>>, vector<2x1024xf32>,
    return
  }
  func.func @transform_0(%arg0: i32) -> (i32, i32) {
    %c0_i32 = arith.constant 0 : i32
    %c0_i32_0 = arith.constant 0 : i32
    return %arg0, %c0_i32 : i32, i32
  }
  func.func @transform_1(%arg0: i32) -> (i32, i32) {
    %c0_i32 = arith.constant 0 : i32
    %c0_i32_0 = arith.constant 0 : i32
    return %arg0, %c0_i32 : i32, i32
  }
}

</mosaic_0001>

<bundles_post_ra>
// kernel: tpu_custom_call.1
= control target key start
LH: loop header
LB: loop body
LE: loop exit
PB: predicated region body
PF: predicated region fallthrough
CT: control target
= control target key end

     0   :  { %6 = vsyncpa [#allocation3], 0  ;;  %s619_s0 = inlined_call_operand.hbm [shape: f32[2,1024], index: 0, kind: input, shape index: {}]   ;;  %s620_s1 = inlined_call_operand.hbm [shape: f32[2,1024], index: 1, kind: output, shape index: {}]  }
   0x1   :  { %7 = vsyncpa [#allocation4], 0  ;;  %s13_s8 = sshll.u32 %s619_s0, 4  ;;  %s421_s9 = smov [#allocation2]   ;;  %s14_s8 = int_to_ptr.hbm [resolvable:$true] %s13_s8 }
   0x2   :  { %s15_s10 = sshll.u32 %s421_s9, 4  ;;  %s16_s10 = int_to_ptr.vmem [resolvable:$true] %s15_s10 }
   0x3   :  { %18 = dma.hbm_to_vmem [thread:$0]  %s14_s8, 256, %s16_s10, [#allocation3]  }
   0x4   :  { %417 = dma.done.wait [#allocation3], 256  }
   0x5   :  { %418 = vsyncadd [#allocation3], 4294967040  ;;  %v443_v0 = vld [vmem:[#allocation2] sm:$0xff]  ;;  %v445_v1 = vld [vmem:[#allocation2 + $0x8] sm:$0xff]  ;;  %v422_v23 = vmov 683565275  }
   0x6   :  { %v25_v2 = vand.u32 2147483647, %v443_v0  ;;  %v28_v3 = vand.u32 2139095040, %v443_v0  ;;  %v180_v4 = vand.u32 2147483647, %v445_v1  ;;  %v183_v5 = vand.u32 2139095040, %v445_v1 }
   0x7   :  { %v423_v25 = vmov 2475754826   ;;  %v424_v27 = vmov 2131351028   ;;  %v425_v29 = vmov 2102212464  }
   0x8   :  { %v29_v6 = vshrl.u32 %v28_v3, 23  ;;  %v32_v7 = vand.u32 8388607, %v25_v2  ;;  %v184_v8 = vshrl.u32 %v183_v5, 23  ;;  %v187_v12 = vand.u32 8388607, %v180_v4 }
   0x9   :  { %v426_v31 = vmov 920167782   ;;  %v427_v40 = vmov 1326507024   ;;  %s429_s0 = smov [#allocation5]   ;;  %s344_s14 = sshll.u32 %s620_s1, 4  ;;  %s345_s14 = int_to_ptr.hbm [resolvable:$true] %s344_s14 }
   0xa   :  { %v354_v9 = vadd.s32 4294967169, %v29_v6  ;;  %v33_v10 = vor.u32 8388608, %v32_v7  ;;  %v357_v11 = vadd.s32 4294967169, %v184_v8  ;;  %v188_v17 = vor.u32 8388608, %v187_v12  ;;  %s342_s11 = sshll.u32 %s429_s0, 4  ;;  %s343_s11 = int_to_ptr.vmem [resolvable:$true] %s342_s11 }
   0xc   :  { %v35_v13 = vadd.s32 1, %v354_v9  ;;  %v190_v14 = vadd.s32 1, %v357_v11  ;;  %v455_v16 = vshll.u32 %v33_v10, 8  ;;  %v465_v34 = vshll.u32 %v188_v17, 8 }
   0xe   :  { %vm36_vm0 = vcmp.gt.s32.totalorder %v35_v13, 0  ;;  %vm191_vm1 = vcmp.gt.s32.totalorder %v190_v14, 0  ;;  %v74_v33 = vand.u32 65535, %v455_v16  ;;  %v75_v38 = vshrl.u32 %v455_v16, 16 }
   0xf   :  { %v37_v15 = vsel %vm36_vm0, %v35_v13, 0  ;;  %v192_v19 = vsel %vm191_vm1, %v190_v14, 0 }
  0x10   :  { %v39_v18 = vand.u32 31, %v37_v15  ;;  %v457_v20 = vshrl.u32 %v37_v15, 5  ;;  %v459_v21 = vand.u32 31, %v192_v19  ;;  %v483_v51 = vshrl.u32 %v192_v19, 5 }
  0x12   :  { %v40_v22 = vsub.s32 32, %v39_v18  ;;  %v42_v24 = vshll.u32 %v422_v23, %v39_v18  ;;  %v45_v26 = vshll.u32 %v423_v25, %v39_v18  ;;  %v48_v28 = vshll.u32 %v424_v27, %v39_v18 }
  0x13   :  { %v51_v30 = vshll.u32 %v425_v29, %v39_v18  ;;  %v54_v32 = vshll.u32 %v426_v31, %v39_v18  ;;  %vm57_vm2 = vcmp.lt.s32.totalorder %v457_v20, 1  ;;  %vm60_vm3 = vcmp.lt.s32.totalorder %v457_v20, 4 }
  0x14   :  { %v43_v35 = vshrl.u32 %v423_v25, %v40_v22  ;;  %v46_v36 = vshrl.u32 %v424_v27, %v40_v22  ;;  %v49_v37 = vshrl.u32 %v425_v29, %v40_v22  ;;  %v52_v39 = vshrl.u32 %v426_v31, %v40_v22 }
  0x15   :  { %v55_v41 = vshrl.u32 %v427_v40, %v40_v22  ;;  %v474_v45 = vsub.s32 32, %v459_v21  ;;  %v41_v46 = vshrl.u32 %v422_v23, %v40_v22  ;;  %vm59_vm4 = vcmp.lt.s32.totalorder %v457_v20, 3 }
  0x16   :  { %v44_v42 = vor.u32 %v43_v35, %v42_v24  ;;  %v47_v43 = vor.u32 %v46_v36, %v45_v26  ;;  %v50_v44 = vor.u32 %v49_v37, %v48_v28  ;;  %v53_v47 = vor.u32 %v52_v39, %v51_v30 }
  0x17   :  { %v56_v48 = vor.u32 %v55_v41, %v54_v32  ;;  %vm58_vm5 = vcmp.lt.s32.totalorder %v457_v20, 2  ;;  %v197_v54 = vshll.u32 %v422_v23, %v459_v21  ;;  %v200_v55 = vshll.u32 %v423_v25, %v459_v21 }
  0x18   :  { %v65_v49 = vsel %vm57_vm2, %v44_v42, %v47_v43  ;;  %v69_v50 = vsel %vm57_vm2, %v47_v43, %v50_v44  ;;  %v66_v52 = vsel %vm60_vm3, %v53_v47, 920167782  ;;  %v62_v56 = vsel %vm60_vm3, %v50_v44, 2102212464 }
  0x19   :  { %v70_v53 = vsel %vm60_vm3, %v56_v48, 1326507024  ;;  %v67_v57 = vsel %vm59_vm4, %v50_v44, %v66_v52  ;;  %v198_v59 = vshrl.u32 %v423_v25, %v474_v45  ;;  %v61_v60 = vsel %vm57_vm2, %v41_v46, %v44_v42 }
  0x1a   :  { %v71_v58 = vsel %vm59_vm4, %v53_v47, %v70_v53  ;;  %v68_v61 = vsel %vm58_vm5, %v65_v49, %v67_v57  ;;  %v201_v63 = vshrl.u32 %v424_v27, %v474_v45  ;;  %v63_v8 = vsel %vm59_vm4, %v47_v43, %v62_v56 }
  0x1b   :  { %v72_v62 = vsel %vm58_vm5, %v69_v50, %v71_v58  ;;  %v98_v6 = vand.u32 65535, %v68_v61  ;;  %v99_v7 = vshrl.u32 %v68_v61, 16  ;;  %v508_v9 = vor.u32 %v198_v59, %v197_v54 }
  0x1c   :  { %v76_v3 = vand.u32 65535, %v72_v62  ;;  %v77_v5 = vshrl.u32 %v72_v62, 16  ;;  %v510_v10 = vor.u32 %v201_v63, %v200_v55  ;;  %v203_v11 = vshll.u32 %v424_v27, %v459_v21 }
  0x1d   :  { %v204_v15 = vshrl.u32 %v425_v29, %v474_v45  ;;  %v100_v18 = vmul.u32 %v98_v6, %v74_v33  ;;  %v101_v19 = vmul.u32 %v99_v7, %v74_v33  ;;  %v102_v22 = vmul.u32 %v98_v6, %v75_v38 }
  0x1e   :  { %v78_v12 = vmul.u32 %v76_v3, %v74_v33  ;;  %v79_v13 = vmul.u32 %v77_v5, %v74_v33  ;;  %v80_v14 = vmul.u32 %v76_v3, %v75_v38  ;;  %v81_v17 = vmul.u32 %v77_v5, %v75_v38 }
  0x1f   :  { %v103_v28 = vmul.u32 %v99_v7, %v75_v38  ;;  %v104_v32 = vshll.u32 %v101_v19, 16  ;;  %v105_v35 = vshrl.u32 %v101_v19, 16  ;;  %v106_v36 = vshll.u32 %v102_v22, 16 }
  0x20   :  { %v82_v24 = vshll.u32 %v79_v13, 16  ;;  %v83_v25 = vshrl.u32 %v79_v13, 16  ;;  %v84_v26 = vshll.u32 %v80_v14, 16  ;;  %v85_v30 = vshrl.u32 %v80_v14, 16 }
  0x21   :  { %v107_v37 = vshrl.u32 %v102_v22, 16  ;;  %v206_v39 = vshll.u32 %v425_v29, %v459_v21  ;;  %v428_v41 = vmov 0   ;;  %vm108_vm7 = vc.u32 %v100_v18, %v104_v32 }
  0x22   :  { %vm86_vm6 = vc.u32 %v78_v12, %v82_v24  ;;  %v88_v27 = vadd.s32 %v82_v24, %v78_v12  ;;  %v110_v33 = vadd.s32 %v104_v32, %v100_v18  ;;  %v207_v43 = vshrl.u32 %v426_v31, %v474_v45 }
  0x23   :  { %v87_v42 = vsel %vm86_vm6, 1, %v428_v41  ;;  %v109_v38 = vsel %vm108_vm7, 1, %v428_v41  ;;  %v209_v46 = vshll.u32 %v426_v31, %v459_v21  ;;  %v205_v29 = vor.u32 %v204_v15, %v203_v11 }
  0x24   :  { %v89_v44 = vadd.s32 %v87_v42, %v81_v17  ;;  %vm90_vm8 = vc.u32 %v88_v27, %v84_v26  ;;  %v111_v48 = vadd.s32 %v109_v38, %v103_v28  ;;  %vm112_vm9 = vc.u32 %v110_v33, %v106_v36 }
  0x25   :  { %v91_v47 = vsel %vm90_vm8, 1, %v428_v41  ;;  %v113_v50 = vsel %vm112_vm9, 1, %v428_v41  ;;  %v208_v52 = vor.u32 %v207_v43, %v206_v39  ;;  %v210_v53 = vshrl.u32 %v427_v40, %v474_v45 }
  0x26   :  { %v93_v49 = vadd.s32 %v91_v47, %v89_v44  ;;  %v527_v54 = vadd.s32 %v110_v33, %v106_v36  ;;  %v115_v55 = vadd.s32 %v113_v50, %v111_v48  ;;  %vm212_vm10 = vcmp.lt.s32.totalorder %v483_v51, 1 }
  0x27   :  { %vm214_vm11 = vcmp.lt.s32.totalorder %v483_v51, 3  ;;  %v211_v31 = vor.u32 %v210_v53, %v209_v46  ;;  %vm213_vm12 = vcmp.lt.s32.totalorder %v483_v51, 2  ;;  %vm215_vm13 = vcmp.lt.s32.totalorder %v483_v51, 4 }
  0x28   :  { %v94_v21 = vadd.s32 %v93_v49, %v83_v25  ;;  %v64_v56 = vsel %vm58_vm5, %v61_v60, %v63_v8  ;;  %v116_v57 = vadd.s32 %v115_v55, %v105_v35  ;;  %v220_v40 = vsel %vm212_vm10, %v508_v9, %v510_v10 }
  0x29   :  { %v221_v58 = vsel %vm215_vm13, %v208_v52, 920167782  ;;  %v224_v62 = vsel %vm212_vm10, %v510_v10, %v205_v29  ;;  %v229_v20 = vand.u32 65535, %v465_v34  ;;  %v225_v3 = vsel %vm215_vm13, %v211_v31, 1326507024 }
  0x2a   :  { %v541_v59 = vadd.s32 %v94_v21, %v85_v30  ;;  %v222_v61 = vsel %vm214_vm11, %v205_v29, %v221_v58  ;;  %v117_v60 = vadd.s32 %v116_v57, %v107_v37  ;;  %v230_v5 = vshrl.u32 %v465_v34, 16 }
  0x2b   :  { %v223_v63 = vsel %vm213_vm12, %v220_v40, %v222_v61  ;;  %v118_v6 = vmul.u32 %v455_v16, %v64_v56  ;;  %v226_v7 = vsel %vm214_vm11, %v208_v52, %v225_v3  ;;  %v196_v18 = vshrl.u32 %v422_v23, %v474_v45 }
  0x2c   :  { %vm120_vm14 = vc.u32 %v541_v59, %v527_v54  ;;  %v253_v8 = vand.u32 65535, %v223_v63  ;;  %v121_v11 = vadd.s32 1, %v117_v60  ;;  %v227_v12 = vsel %vm213_vm12, %v224_v62, %v226_v7 }
  0x2d   :  { %v254_v13 = vshrl.u32 %v223_v63, 16  ;;  %v231_v14 = vand.u32 65535, %v227_v12  ;;  %v232_v15 = vshrl.u32 %v227_v12, 16  ;;  %v217_v35 = vsel %vm215_vm13, %v205_v29, 2102212464 }
  0x2e   :  { %v122_v17 = vsel %vm120_vm14, %v121_v11, %v117_v60  ;;  %v257_v16 = vmul.u32 %v253_v8, %v230_v5  ;;  %v255_v26 = vmul.u32 %v253_v8, %v229_v20  ;;  %v216_v37 = vsel %vm212_vm10, %v196_v18, %v508_v9 }
  0x2f   :  { %v256_v19 = vmul.u32 %v254_v13, %v229_v20  ;;  %v123_v22 = vadd.s32 %v122_v17, %v118_v6  ;;  %v233_v24 = vmul.u32 %v231_v14, %v229_v20  ;;  %v234_v25 = vmul.u32 %v232_v15, %v229_v20 }
  0x30   :  { %v235_v28 = vmul.u32 %v231_v14, %v230_v5  ;;  %v236_v36 = vmul.u32 %v232_v15, %v230_v5  ;;  %v258_v23 = vmul.u32 %v254_v13, %v230_v5  ;;  %v261_v45 = vshll.u32 %v257_v16, 16 }
  0x31   :  { %v259_v30 = vshll.u32 %v256_v19, 16  ;;  %v124_v32 = vadd.s32 536870912, %v123_v22  ;;  %v237_v27 = vshll.u32 %v234_v25, 16  ;;  %v218_v43 = vsel %vm214_vm11, %v510_v10, %v217_v35 }
  0x32   :  { %v239_v39 = vshll.u32 %v235_v28, 16  ;;  %v238_v9 = vshrl.u32 %v234_v25, 16  ;;  %v260_v49 = vshrl.u32 %v256_v19, 16  ;;  %v240_v53 = vshrl.u32 %v235_v28, 16 }
  0x33   :  { %v568_v42 = vshrl.u32 %v124_v32, 30  ;;  %vm241_vm15 = vc.u32 %v233_v24, %v237_v27  ;;  %v243_v33 = vadd.s32 %v237_v27, %v233_v24  ;;  %vm263_vm0 = vc.u32 %v255_v26, %v259_v30 }
  0x34   :  { %v242_v44 = vsel %vm241_vm15, 1, %v428_v41  ;;  %v264_v38 = vsel %vm263_vm0, 1, %v428_v41  ;;  %v265_v46 = vadd.s32 %v259_v30, %v255_v26  ;;  %v262_v21 = vshrl.u32 %v257_v16, 16 }
  0x35   :  { %v126_v47 = vshll.u32 %v568_v42, 30  ;;  %v244_v48 = vadd.s32 %v242_v44, %v236_v36  ;;  %vm245_vm1 = vc.u32 %v243_v33, %v239_v39  ;;  %v266_v50 = vadd.s32 %v264_v38, %v258_v23 }
  0x36   :  { %v246_v29 = vsel %vm245_vm1, 1, %v428_v41  ;;  %vm267_vm2 = vc.u32 %v265_v46, %v261_v45  ;;  %v269_v40 = vadd.s32 %v265_v46, %v261_v45  ;;  %v219_v58 = vsel %vm213_vm12, %v216_v37, %v218_v43 }
  0x37   :  { %v127_v52 = vsub.s32 %v123_v22, %v126_v47  ;;  %v248_v55 = vadd.s32 %v246_v29, %v244_v48  ;;  %v268_v10 = vsel %vm267_vm2, 1, %v428_v41  ;;  %v273_v3 = vmul.u32 %v465_v34, %v219_v58 }
  0x38   :  { %v270_v31 = vadd.s32 %v268_v10, %v266_v50  ;;  %v119_v41 = vadd.s32 %v527_v54, %v541_v59  ;;  %v149_v28 = vsub.s32 4, %v568_v42  ;;  %vm27_vm7 = vcmp.lt.s32.totalorder %v443_v0, 0 }
  0x39   :  { %vm128_vm3 = vcmp.lt.s32.totalorder %v127_v52, 0  ;;  %v129_v56 = vsub.s32 0, %v127_v52  ;;  %v249_v57 = vadd.s32 %v248_v55, %v238_v9  ;;  %vm590_vm8 = vcmp.le.f32.partialorder %v25_v2, 0.7853982 }
  0x3a   :  { %v271_v61 = vadd.s32 %v270_v31, %v260_v49  ;;  %v150_v37 = vsel %vm27_vm7, %v149_v28, %v568_v42  ;;  %vm182_vm11 = vcmp.lt.s32.totalorder %v445_v1, 0  ;;  %vm604_vm13 = vcmp.le.f32.partialorder %v180_v4, 0.7853982 }
  0x3b   :  { %v130_v62 = vsel %vm128_vm3, %v129_v56, %v127_v52  ;;  %v250_v20 = vadd.s32 %v249_v57, %v240_v53  ;;  %v152_v43 = vsel %vm590_vm8, 0, %v150_v37  ;;  %vm168_vm15 = vweird.f32 %v443_v0 }
  0x3c   :  { %v131_v60 = vclz %v130_v62  ;;  %v272_v63 = vadd.s32 %v271_v61, %v262_v21  ;;  %v169_v49 = vadd.s32 3, %v152_v43  ;;  %vm323_vm3 = vweird.f32 %v445_v1 }
  0x3d   :  { %vm275_vm4 = vc.u32 %v250_v20, %v269_v40  ;;  %v274_v33 = vadd.s32 %v269_v40, %v250_v20 }
  0x3e   :  { %v355_v5 = vadd.s32 4294967294, %v131_v60  ;;  %v276_v6 = vadd.s32 1, %v272_v63  ;;  %v170_v56 = vand.u32 3, %v169_v49 }
  0x40   :  { %vm356_vm5 = vcmp.lt.s32.totalorder %v355_v5, 0  ;;  %v277_v7 = vsel %vm275_vm4, %v276_v6, %v272_v63  ;;  %vm175_vm10 = vcmp.eq.s32.totalorder %v170_v56, 2  ;;  %vm172_vm12 = vcmp.eq.s32.totalorder %v170_v56, 0 }
  0x41   :  { %v134_v8 = vsel %vm356_vm5, 0, %v355_v5  ;;  %v278_v11 = vadd.s32 %v277_v7, %v273_v3  ;;  %vm171_vm14 = vcmp.lt.s32.totalorder %v170_v56, 2 }
  0x42   :  { %v135_v12 = vsub.s32 32, %v134_v8  ;;  %v136_v51 = vshll.u32 %v127_v52, %v134_v8  ;;  %v139_v13 = vsub.s32 4294967266, %v134_v8 }
  0x43   :  { %v279_v14 = vadd.s32 536870912, %v278_v11 }
  0x44   :  { %v137_v15 = vshrl.u32 %v119_v41, %v135_v12  ;;  %v140_v17 = vadd.s32 127, %v139_v13 }
  0x45   :  { %v583_v18 = vshrl.u32 %v279_v14, 30 }
  0x46   :  { %v138_v19 = vor.u32 %v137_v15, %v136_v51  ;;  %v141_v34 = vshll.u32 %v140_v17, 23 }
  0x47   :  { %v281_v16 = vshll.u32 %v583_v18, 30  ;;  %v304_v6 = vsub.s32 4, %v583_v18 }
  0x48   :  { %v142_v22 = vor.u32 4788187, %v141_v34  ;;  %v145_v24 = vcvt.s32.f32 %v138_v19 }
  0x49   :  { %v282_v25 = vsub.s32 %v278_v11, %v281_v16  ;;  %v305_v13 = vsel %vm182_vm11, %v304_v6, %v583_v18 }
  0x4a   :  { %v143_v54 = vand.u32 2147483647, %v142_v22  ;;  %v307_v19 = vsel %vm604_vm13, 0, %v305_v13 }
  0x4b   :  { %vm283_vm6 = vcmp.lt.s32.totalorder %v282_v25, 0  ;;  %v284_v59 = vsub.s32 0, %v282_v25 }
  0x4c   :  { %v146_v26 = vmul.f32 %v145_v24, %v143_v54 }
  0x4d   :  { %v285_v30 = vsel %vm283_vm6, %v284_v59, %v282_v25 }
  0x4e   :  { %v147_v35 = vxor.u32 2147483648, %v146_v26  ;;  %v286_v36 = vclz %v285_v30 }
  0x50   :  { %v148_v27 = vsel %vm27_vm7, %v147_v35, %v146_v26  ;;  %v358_v39 = vadd.s32 4294967294, %v286_v36 }
  0x51   :  { %v151_v23 = vsel %vm590_vm8, %v443_v0, %v148_v27  ;;  %v324_v0 = vadd.s32 3, %v307_v19 }
  0x52   :  { %v153_v45 = vmul.f32 %v151_v23, %v151_v23  ;;  %vm359_vm9 = vcmp.lt.s32.totalorder %v358_v39, 0 }
  0x53   :  { %v289_v2 = vsel %vm359_vm9, 0, %v358_v39  ;;  %v325_v26 = vand.u32 3, %v324_v0 }
  0x54   :  { %v154_v44 = vmul.f32 -0.001358992, %v153_v45  ;;  %v161_v38 = vmul.f32 -0.00019511016, %v153_v45  ;;  %v290_v46 = vsub.s32 32, %v289_v2  ;;  %v291_v47 = vshll.u32 %v282_v25, %v289_v2 }
  0x55   :  { %v294_v9 = vsub.s32 4294967266, %v289_v2  ;;  %vm330_vm0 = vcmp.eq.s32.totalorder %v325_v26, 2  ;;  %vm327_vm1 = vcmp.eq.s32.totalorder %v325_v26, 0  ;;  %vm326_vm2 = vcmp.lt.s32.totalorder %v325_v26, 2 }
  0x56   :  { %v155_v48 = vadd.f32 0.041655596, %v154_v44  ;;  %v162_v29 = vadd.f32 0.008332121, %v161_v38  ;;  %v292_v42 = vshrl.u32 %v274_v33, %v290_v46 }
  0x57   :  { %v295_v50 = vadd.s32 127, %v294_v9 }
  0x58   :  { %v156_v52 = vmul.f32 %v155_v48, %v153_v45  ;;  %v163_v53 = vmul.f32 %v162_v29, %v153_v45  ;;  %v293_v55 = vor.u32 %v292_v42, %v291_v47 }
  0x59   :  { %v296_v10 = vshll.u32 %v295_v50, 23 }
  0x5a   :  { %v157_v21 = vadd.f32 -0.4999988, %v156_v52  ;;  %v164_v31 = vadd.f32 -0.16666654, %v163_v53  ;;  %v300_v40 = vcvt.s32.f32 %v293_v55 }
  0x5b   :  { %v297_v57 = vor.u32 4788187, %v296_v10 }
  0x5c   :  { %v158_v58 = vmul.f32 %v157_v21, %v153_v45  ;;  %v165_v61 = vmul.f32 %v164_v31, %v153_v45 }
  0x5d   :  { %v298_v62 = vand.u32 2147483647, %v297_v57 }
  0x5e   :  { %v159_v20 = vadd.f32 1.0, %v158_v58  ;;  %v166_v60 = vadd.f32 1.0, %v165_v61 }
  0x5f   :  { %v301_v63 = vmul.f32 %v300_v40, %v298_v62 }
  0x60   :  { %v167_v3 = vmul.f32 %v166_v60, %v151_v23  ;;  %v176_v5 = vxor.u32 2147483648, %v159_v20 }
  0x61   :  { %v302_v7 = vxor.u32 2147483648, %v301_v63 }
  0x62   :  { %v173_v8 = vxor.u32 2147483648, %v167_v3  ;;  %v177_v11 = vsel %vm175_vm10, %v176_v5, %v167_v3 }
  0x63   :  { %v303_v12 = vsel %vm182_vm11, %v302_v7, %v301_v63 }
  0x64   :  { %v174_v51 = vsel %vm172_vm12, %v159_v20, %v173_v8  ;;  %v306_v14 = vsel %vm604_vm13, %v445_v1, %v303_v12 }
  0x65   :  { %v178_v15 = vsel %vm171_vm14, %v174_v51, %v177_v11  ;;  %v308_v17 = vmul.f32 %v306_v14, %v306_v14 }
  0x66   :  { %v179_v4 = vsel %vm168_vm15, nan, %v178_v15 }
  0x67   :  { %v309_v34 = vmul.f32 -0.001358992, %v308_v17  ;;  %v316_v16 = vmul.f32 -0.00019511016, %v308_v17  ;;  %335 = vst [vmem:[#allocation5] sm:$0xff] %v179_v4 }
  0x69   :  { %v310_v22 = vadd.f32 0.041655596, %v309_v34  ;;  %v317_v24 = vadd.f32 0.008332121, %v316_v16 }
  0x6b   :  { %v311_v25 = vmul.f32 %v310_v22, %v308_v17  ;;  %v318_v54 = vmul.f32 %v317_v24, %v308_v17 }
  0x6d   :  { %v312_v59 = vadd.f32 -0.4999988, %v311_v25  ;;  %v319_v18 = vadd.f32 -0.16666654, %v318_v54 }
  0x6f   :  { %v313_v28 = vmul.f32 %v312_v59, %v308_v17  ;;  %v320_v30 = vmul.f32 %v319_v18, %v308_v17 }
  0x71   :  { %v314_v32 = vadd.f32 1.0, %v313_v28  ;;  %v321_v35 = vadd.f32 1.0, %v320_v30 }
  0x73   :  { %v322_v36 = vmul.f32 %v321_v35, %v306_v14  ;;  %v331_v27 = vxor.u32 2147483648, %v314_v32 }
  0x75   :  { %v328_v37 = vxor.u32 2147483648, %v322_v36  ;;  %v332_v39 = vsel %vm330_vm0, %v331_v27, %v322_v36 }
  0x77   :  { %v329_v23 = vsel %vm327_vm1, %v314_v32, %v328_v37 }
  0x78   :  { %v333_v45 = vsel %vm326_vm2, %v329_v23, %v332_v39 }
  0x79   :  { %v334_v33 = vsel %vm323_vm3, nan, %v333_v45 }
  0x7a   :  { %336 = vst [vmem:[#allocation5 + $0x8] sm:$0xff] %v334_v33 }
  0x7b   :  { %347 = dma.vmem_to_hbm [thread:$0]  %s343_s11, 256, %s345_s14, [#allocation4]  }
  0x7c   :  { %419 = dma.done.wait [#allocation4], 256  }
  0x7d   :  { %420 = vsyncadd [#allocation4], 4294967040 }
  0x7e   :  { %352 = vsyncpa [#allocation3], 1 }
  0x7f   :  { %353 = vsyncpa [#allocation4], 1 }

</bundles_post_ra>
